<compile_context>
chip_gen: v5e
topology: v5e:2x2
jax: 0.10.0
libtpu: 0.0.40
codegen_flags: <defaults>
</compile_context>

<pallas_src>
import jax
import jax.numpy as jnp
from jax.experimental import pallas as pl
from jax.experimental.pallas import tpu as pltpu

IN_FEATURES = 512
NUM_LABELS = 8            # stand-in for len(LABELS_MAP)
MAX_TB = 1024             # max batch-tile rows (keeps f32 working set ~4.5 MiB)


def _round_up(x, m):
    return ((x + m - 1) // m) * m


def _batch_tile(batch):
    """Pick a legal, large batch tile.

    Block sublane dim must be a multiple of 8 or equal the full batch extent.
    For mid/large batches we aim for >=2 grid steps so v7x's second TensorCore
    gets a tile (dimension_semantics=("parallel",)).
    """
    if batch >= 2 * MAX_TB:
        return MAX_TB                                   # many large tiles
    if batch >= 256:
        return min(MAX_TB, _round_up(pl.cdiv(batch, 2), 8))  # exactly ~2 tiles
    return batch                                        # single full-extent tile


def linear_kernel(x_ref, w_ref, b_ref, o_ref):
    # One MXU matmul per (tb, 512) x-tile; f32 accumulate, bias add, store.
    acc = jnp.dot(x_ref[...], w_ref[...], preferred_element_type=jnp.float32)
    o_ref[...] = (acc + b_ref[...]).astype(o_ref.dtype)


def base_neural_network_forward(x, w_t, b):
    """forward(x) = x @ W.T + b.

    x:   (B, 512)            (f32, or bf16 if the caller already holds bf16)
    w_t: (512, C)            (W already transposed, unpadded)
    b:   (C,) or (1, C)
    """
    batch, in_f = x.shape
    out_f = w_t.shape[1]
    bias2d = jnp.reshape(b, (1, out_f))

    tb = _batch_tile(batch)
    grid = (pl.cdiv(batch, tb),)
    out_dtype = x.dtype

    return pl.pallas_call(
        linear_kernel,
        out_shape=jax.ShapeDtypeStruct((batch, out_f), out_dtype),
        grid=grid,
        in_specs=[
            # x tile: streamed / double-buffered per grid step.
            pl.BlockSpec((tb, in_f), lambda i: (i, 0)),
            # W: full array, constant index_map -> resident in VMEM across grid.
            pl.BlockSpec((in_f, out_f), lambda i: (0, 0)),
            # bias: resident across grid.
            pl.BlockSpec((1, out_f), lambda i: (0, 0)),
        ],
        # Last dim equals the full output extent -> legal block; partial last
        # batch block is masked on store.
        out_specs=pl.BlockSpec((tb, out_f), lambda i: (i, 0)),
        compiler_params=pltpu.CompilerParams(
            dimension_semantics=("parallel",),   # batch tiles shard across TCs (v7x)
        ),
        cost_estimate=pl.CostEstimate(
            flops=2 * batch * in_f * out_f,
            transcendentals=0,
            bytes_accessed=(
                x.size * x.dtype.itemsize
                + w_t.size * w_t.dtype.itemsize
                + bias2d.size * bias2d.dtype.itemsize
                + batch * out_f * jnp.dtype(out_dtype).itemsize
            ),
        ),
    )(x, w_t, bias2d)


if __name__ == "__main__":
    key = jax.random.PRNGKey(0)
    k_x, k_w, k_b = jax.random.split(key, 3)

    batch = 2
    # Deterministic parameter init (matching nn.Linear's uniform range scale).
    bound = 1.0 / (IN_FEATURES ** 0.5)
    w_t = jax.random.uniform(
        k_w, (IN_FEATURES, NUM_LABELS), jnp.float32, minval=-bound, maxval=bound
    )  # (in, out) == W.T
    bias = jax.random.uniform(
        k_b, (NUM_LABELS,), jnp.float32, minval=-bound, maxval=bound
    )
    x = jax.random.normal(k_x, (batch, IN_FEATURES), jnp.float32)

    out = base_neural_network_forward(x, w_t, bias)
    out = jax.block_until_ready(out)

    # Reference check in plain JAX.
    ref = x @ w_t + bias
    assert out.shape == (batch, NUM_LABELS)
    assert jnp.allclose(out, ref, atol=1e-5, rtol=1e-5)

    print("KERNEL_OK")
</pallas_src>

<mosaic_0001>
module attributes {stable_mosaic.version = 11 : i64} {
  func.func @linear_kernel(%arg0: i32, %arg1: memref<2x512xf32, #tpu.memory_space<vmem>>, %arg2: memref<512x8xf32, #tpu.memory_space<vmem>>, %arg3: memref<1x8xf32, #tpu.memory_space<vmem>>, %arg4: memref<2x8xf32, #tpu.memory_space<vmem>>) attributes {dimension_semantics = [#tpu.dimension_semantics<parallel>], iteration_bounds = array<i64: 1>, scalar_prefetch = 0 : i64, scratch_operands = 0 : i64, tpu.core_type = #tpu.core_type<tc>, window_params = [{transform_indices = @transform_0, window_bounds = array<i64: 2, 512>}, {pipeline_mode = #tpu.pipeline_mode<synchronous>, transform_indices = @transform_1, window_bounds = array<i64: 512, 8>}, {pipeline_mode = #tpu.pipeline_mode<synchronous>, transform_indices = @transform_2, window_bounds = array<i64: 1, 8>}, {transform_indices = @transform_3, window_bounds = array<i64: 2, 8>}]} {
    %c0 = arith.constant 0 : index
    %c0_0 = arith.constant 0 : index
    %0 = vector.load %arg1[%c0, %c0_0] : memref<2x512xf32, #tpu.memory_space<vmem>>, vector<2x512xf32>
    %c0_1 = arith.constant 0 : index
    %c0_2 = arith.constant 0 : index
    %1 = vector.load %arg2[%c0_1, %c0_2] : memref<512x8xf32, #tpu.memory_space<vmem>>, vector<512x8xf32>
    %cst = arith.constant dense<0.000000e+00> : vector<2x8xf32>
    %2 = tpu.matmul %0, %1, %cst {dimension_numbers = #tpu.dot_dimension_numbers<[1], [0], [0], [1], [0, 0, 1, 1], [], []>} : vector<2x512xf32>, vector<512x8xf32>, vector<2x8xf32> -> vector<2x8xf32>
    %c0_3 = arith.constant 0 : index
    %c0_4 = arith.constant 0 : index
    %3 = vector.load %arg3[%c0_3, %c0_4] : memref<1x8xf32, #tpu.memory_space<vmem>>, vector<1x8xf32>
    %4 = vector.broadcast %3 : vector<1x8xf32> to vector<2x8xf32>
    %5 = arith.addf %2, %4 : vector<2x8xf32>
    %c0_5 = arith.constant 0 : index
    %c0_6 = arith.constant 0 : index
    %6 = vector.load %arg4[%c0_5, %c0_6] : memref<2x8xf32, #tpu.memory_space<vmem>>, vector<2x8xf32>
    tpu.vector_store %arg4[%c0_5, %c0_6], %5 {strides = array<i32>} : memref<2x8xf32, #tpu.memory_space<vmem>>, vector<2x8xf32>,
    return
  }
  func.func @transform_0(%arg0: i32) -> (i32, i32) {
    %c0_i32 = arith.constant 0 : i32
    %c0_i32_0 = arith.constant 0 : i32
    return %arg0, %c0_i32 : i32, i32
  }
  func.func @transform_1(%arg0: i32) -> (i32, i32) {
    %c0_i32 = arith.constant 0 : i32
    %c0_i32_0 = arith.constant 0 : i32
    %c0_i32_1 = arith.constant 0 : i32
    return %c0_i32, %c0_i32_0 : i32, i32
  }
  func.func @transform_2(%arg0: i32) -> (i32, i32) {
    %c0_i32 = arith.constant 0 : i32
    %c0_i32_0 = arith.constant 0 : i32
    %c0_i32_1 = arith.constant 0 : i32
    return %c0_i32, %c0_i32_0 : i32, i32
  }
  func.func @transform_3(%arg0: i32) -> (i32, i32) {
    %c0_i32 = arith.constant 0 : i32
    %c0_i32_0 = arith.constant 0 : i32
    return %arg0, %c0_i32 : i32, i32
  }
}

</mosaic_0001>

<bundles_post_ra>
// kernel: tpu_custom_call.1
= control target key start
LH: loop header
LB: loop body
LE: loop exit
PB: predicated region body
PF: predicated region fallthrough
CT: control target
= control target key end

     0   :  { %s442_s0 = inlined_call_operand.vmem [shape: f32[2,512], index: 0, kind: input, shape index: {}]   ;;  %s443_s1 = inlined_call_operand.vmem [shape: f32[512,8], index: 1, kind: input, shape index: {}]   ;;  %s444_s2 = inlined_call_operand.vmem [shape: f32[1,8], index: 2, kind: input, shape index: {}]   ;;  %s445_s3 = inlined_call_operand.hbm [shape: f32[2,8], index: 3, kind: output, shape index: {}]  }
   0x1   :  { %v63_v0 = vld [vmem:[%s443_s1 + $0x178] sm:$0xff]  ;;  %v62_v2 = vld [vmem:[%s443_s1 + $0x170] sm:$0xff]  ;;  %v61_v6 = vld [vmem:[%s443_s1 + $0x168] sm:$0xff] }
   0x2   :  { %v31_v1 = vld [vmem:[%s443_s1 + $0x78] sm:$0xff]  ;;  %134 = vmatpush.msra.mxu2 %v63_v0  ;;  %v30_v4 = vld [vmem:[%s443_s1 + $0x70] sm:$0xff]  ;;  %v29_v8 = vld [vmem:[%s443_s1 + $0x68] sm:$0xff] }
   0x3   :  { %94 = vmatpush.msra.mxu0 %v31_v1  ;;  %v79_v3 = vld [vmem:[%s443_s1 + $0x1f8] sm:$0xff]  ;;  %v78_v7 = vld [vmem:[%s443_s1 + $0x1f0] sm:$0xff]  ;;  %v77_v10 = vld [vmem:[%s443_s1 + $0x1e8] sm:$0xff] }
   0x4   :  { %v47_v5 = vld [vmem:[%s443_s1 + $0xf8] sm:$0xff]  ;;  %154 = vmatpush.msra.mxu3 %v79_v3  ;;  %135 = vmatpush.msra.mxu2 %v62_v2  ;;  %v46_v9 = vld [vmem:[%s443_s1 + $0xf0] sm:$0xff]  ;;  %v60_v11 = vld [vmem:[%s443_s1 + $0x160] sm:$0xff] }
   0x5   :  { %114 = vmatpush.msra.mxu1 %v47_v5  ;;  %95 = vmatpush.msra.mxu0 %v30_v4  ;;  %v28_v12 = vld [vmem:[%s443_s1 + $0x60] sm:$0xff]  ;;  %v45_v13 = vld [vmem:[%s443_s1 + $0xe8] sm:$0xff]  ;;  %v59_v16 = vld [vmem:[%s443_s1 + $0x158] sm:$0xff] }
   0x6   :  { %155 = vmatpush.msra.mxu3 %v78_v7  ;;  %136 = vmatpush.msra.mxu2 %v61_v6  ;;  %v76_v14 = vld [vmem:[%s443_s1 + $0x1e0] sm:$0xff]  ;;  %v27_v17 = vld [vmem:[%s443_s1 + $0x58] sm:$0xff]  ;;  %v58_v20 = vld [vmem:[%s443_s1 + $0x150] sm:$0xff] }
   0x7   :  { %115 = vmatpush.msra.mxu1 %v46_v9  ;;  %96 = vmatpush.msra.mxu0 %v29_v8  ;;  %v44_v15 = vld [vmem:[%s443_s1 + $0xe0] sm:$0xff]  ;;  %v75_v18 = vld [vmem:[%s443_s1 + $0x1d8] sm:$0xff]  ;;  %v26_v21 = vld [vmem:[%s443_s1 + $0x50] sm:$0xff] }
   0x8   :  { %156 = vmatpush.msra.mxu3 %v77_v10  ;;  %137 = vmatpush.msra.mxu2 %v60_v11  ;;  %v43_v19 = vld [vmem:[%s443_s1 + $0xd8] sm:$0xff]  ;;  %v74_v22 = vld [vmem:[%s443_s1 + $0x1d0] sm:$0xff]  ;;  %v57_v24 = vld [vmem:[%s443_s1 + $0x148] sm:$0xff] }
   0x9   :  { %116 = vmatpush.msra.mxu1 %v45_v13  ;;  %97 = vmatpush.msra.mxu0 %v28_v12  ;;  %v42_v23 = vld [vmem:[%s443_s1 + $0xd0] sm:$0xff]  ;;  %v25_v25 = vld [vmem:[%s443_s1 + $0x48] sm:$0xff]  ;;  %v56_v28 = vld [vmem:[%s443_s1 + $0x140] sm:$0xff] }
   0xa   :  { %157 = vmatpush.msra.mxu3 %v76_v14  ;;  %138 = vmatpush.msra.mxu2 %v59_v16  ;;  %v73_v26 = vld [vmem:[%s443_s1 + $0x1c8] sm:$0xff]  ;;  %v24_v29 = vld [vmem:[%s443_s1 + $0x40] sm:$0xff]  ;;  %v55_v32 = vld [vmem:[%s443_s1 + $0x138] sm:$0xff] }
   0xb   :  { %117 = vmatpush.msra.mxu1 %v44_v15  ;;  %98 = vmatpush.msra.mxu0 %v27_v17  ;;  %v41_v27 = vld [vmem:[%s443_s1 + $0xc8] sm:$0xff]  ;;  %v72_v30 = vld [vmem:[%s443_s1 + $0x1c0] sm:$0xff]  ;;  %v23_v33 = vld [vmem:[%s443_s1 + $0x38] sm:$0xff] }
   0xc   :  { %158 = vmatpush.msra.mxu3 %v75_v18  ;;  %139 = vmatpush.msra.mxu2 %v58_v20  ;;  %v40_v31 = vld [vmem:[%s443_s1 + $0xc0] sm:$0xff]  ;;  %v71_v34 = vld [vmem:[%s443_s1 + $0x1b8] sm:$0xff]  ;;  %v54_v36 = vld [vmem:[%s443_s1 + $0x130] sm:$0xff] }
   0xd   :  { %118 = vmatpush.msra.mxu1 %v43_v19  ;;  %99 = vmatpush.msra.mxu0 %v26_v21  ;;  %v39_v35 = vld [vmem:[%s443_s1 + $0xb8] sm:$0xff]  ;;  %v22_v37 = vld [vmem:[%s443_s1 + $0x30] sm:$0xff]  ;;  %v53_v40 = vld [vmem:[%s443_s1 + $0x128] sm:$0xff] }
   0xe   :  { %159 = vmatpush.msra.mxu3 %v74_v22  ;;  %140 = vmatpush.msra.mxu2 %v57_v24  ;;  %v70_v38 = vld [vmem:[%s443_s1 + $0x1b0] sm:$0xff]  ;;  %v21_v41 = vld [vmem:[%s443_s1 + $0x28] sm:$0xff]  ;;  %v52_v44 = vld [vmem:[%s443_s1 + $0x120] sm:$0xff] }
   0xf   :  { %119 = vmatpush.msra.mxu1 %v42_v23  ;;  %100 = vmatpush.msra.mxu0 %v25_v25  ;;  %v38_v39 = vld [vmem:[%s443_s1 + $0xb0] sm:$0xff]  ;;  %v69_v42 = vld [vmem:[%s443_s1 + $0x1a8] sm:$0xff]  ;;  %v20_v45 = vld [vmem:[%s443_s1 + $0x20] sm:$0xff] }
  0x10   :  { %160 = vmatpush.msra.mxu3 %v73_v26  ;;  %141 = vmatpush.msra.mxu2 %v56_v28  ;;  %v37_v43 = vld [vmem:[%s443_s1 + $0xa8] sm:$0xff]  ;;  %v15_v46 = vld [vmem:[%s442_s0] sm:$0xff]  ;;  %v51_v49 = vld [vmem:[%s443_s1 + $0x118] sm:$0xff] }
  0x11   :  { %120 = vmatpush.msra.mxu1 %v41_v27  ;;  %101 = vmatpush.msra.mxu0 %v24_v29  ;;  %v68_v47 = vld [vmem:[%s443_s1 + $0x1a0] sm:$0xff]  ;;  %85 = vst [vmem:[#allocation1] ss:$4 sm:$0xff] %v15_v46  ;;  %v19_v50 = vld [vmem:[%s443_s1 + $0x18] sm:$0xff] }
  0x12   :  { %161 = vmatpush.msra.mxu3 %v72_v30  ;;  %142 = vmatpush.msra.mxu2 %v55_v32  ;;  %v36_v48 = vld [vmem:[%s443_s1 + $0xa0] sm:$0xff] }
  0x13   :  { %121 = vmatpush.msra.mxu1 %v40_v31  ;;  %102 = vmatpush.msra.mxu0 %v23_v33 }
  0x14   :  { %162 = vmatpush.msra.mxu3 %v71_v34  ;;  %143 = vmatpush.msra.mxu2 %v54_v36 }
  0x15   :  { %122 = vmatpush.msra.mxu1 %v39_v35  ;;  %103 = vmatpush.msra.mxu0 %v22_v37 }
  0x16   :  { %163 = vmatpush.msra.mxu3 %v70_v38  ;;  %144 = vmatpush.msra.mxu2 %v53_v40 }
  0x17   :  { %123 = vmatpush.msra.mxu1 %v38_v39  ;;  %104 = vmatpush.msra.mxu0 %v21_v41 }
  0x18   :  { %164 = vmatpush.msra.mxu3 %v69_v42 }
  0x19   :  { %124 = vmatpush.msra.mxu1 %v37_v43 }
  0x1a   :  { %8 = vsyncpa [#allocation3], 0  ;;  %145 = vmatpush.msra.mxu2 %v52_v44  ;;  %105 = vmatpush.msra.mxu0 %v20_v45  ;;  %v67_v51 = vld [vmem:[%s443_s1 + $0x198] sm:$0xff]  ;;  %v50_v53 = vld [vmem:[%s443_s1 + $0x110] sm:$0xff]  ;;  %s220_s7 = smov [#allocation2]   ;;  %s183_s10 = sshll.u32 %s445_s3, 4  ;;  %s184_s10 = int_to_ptr.hbm [resolvable:$true] %s183_s10 }
  0x1b   :  { %v35_v52 = vld [vmem:[%s443_s1 + $0x98] sm:$0xff]  ;;  %165 = vmatpush.msra.mxu3 %v68_v47  ;;  %125 = vmatpush.msra.mxu1 %v36_v48  ;;  %v18_v54 = vld [vmem:[%s443_s1 + $0x10] sm:$0xff]  ;;  %v49_v57 = vld [vmem:[%s443_s1 + $0x108] sm:$0xff]  ;;  %s181_s8 = sshll.u32 %s220_s7, 4  ;;  %vm174_vm0 = vcmask 58368   ;;  %s182_s8 = int_to_ptr.vmem [resolvable:$true] %s181_s8 }
  0x1c   :  { %146 = vmatpush.msra.mxu2 %v51_v49  ;;  %106 = vmatpush.msra.mxu0 %v19_v50  ;;  %v66_v55 = vld [vmem:[%s443_s1 + $0x190] sm:$0xff]  ;;  %v17_v58 = vld [vmem:[%s443_s1 + $0x8] sm:$0xff]  ;;  %v48_v61 = vld [vmem:[%s443_s1 + $0x100] sm:$0xff] }
  0x1d   :  { %v34_v56 = vld [vmem:[%s443_s1 + $0x90] sm:$0xff]  ;;  %166 = vmatpush.msra.mxu3 %v67_v51  ;;  %126 = vmatpush.msra.mxu1 %v35_v52  ;;  %v65_v59 = vld [vmem:[%s443_s1 + $0x188] sm:$0xff]  ;;  %v16_v62 = vld [vmem:[%s443_s1] sm:$0xff] }
  0x1e   :  { %147 = vmatpush.msra.mxu2 %v50_v53  ;;  %107 = vmatpush.msra.mxu0 %v18_v54  ;;  %v33_v60 = vld [vmem:[%s443_s1 + $0x88] sm:$0xff]  ;;  %v88_v63 = vld.sshfl [vmem:[#allocation1 + $0x10] sm:$0xff pattern:$0x73625140]  ;;  %v64_v0 = vld [vmem:[%s443_s1 + $0x180] sm:$0xff] }
  0x1f   :  { %167 = vmatpush.msra.mxu3 %v66_v55  ;;  %127 = vmatpush.msra.mxu1 %v34_v56  ;;  %v86_v1 = vld.sshfl [vmem:[#allocation1] sm:$0xff pattern:$0x73625140]  ;;  %v89_v2 = vld.sshfl [vmem:[#allocation1 + $0x18] sm:$0xff pattern:$0x73625140] }
  0x20   :  { %148 = vmatpush.msra.mxu2 %v49_v57  ;;  %108 = vmatpush.msra.mxu0 %v17_v58  ;;  %v32_v3 = vld [vmem:[%s443_s1 + $0x80] sm:$0xff]  ;;  %v87_v4 = vld.sshfl [vmem:[#allocation1 + $0x8] sm:$0xff pattern:$0x73625140] }
  0x21   :  { %168 = vmatpush.msra.mxu3 %v65_v59  ;;  %128 = vmatpush.msra.mxu1 %v33_v60  ;;  %v193_v5 = vld [vmem:[%s444_s2] ss:$0 sm:$0xff] }
  0x22   :  { %149 = vmatpush.msra.mxu2 %v48_v61  ;;  %109 = vmatpush.msra.mxu0 %v16_v62 }
  0x23   :  { %150 = vmatmul.f32.vlgmr.msra.gmra.mxu2 %v88_v63  ;;  %169 = vmatpush.msra.mxu3 %v64_v0 }
  0x24   :  { %110 = vmatmul.f32.vlgmr.msra.gmra.mxu0 %v86_v1  ;;  %170 = vmatmul.f32.vlgmr.msra.gmra.mxu3 %v89_v2 }
  0x25   :  { %129 = vmatpush.msra.mxu1 %v32_v3 }
  0x26   :  { %130 = vmatmul.f32.vlgmr.msra.gmra.mxu1 %v87_v4 }
  0xa1   :  { %v111_v6 = vpop.f32.mrf.mxu0 }
  0xa2   :  { %v112_v7 = vadd.f32 %v193_v5, %v111_v6 }
  0xa3   :  { %v131_v8 = vpop.f32.mrf.mxu1 }
  0xa4   :  { %v132_v9 = vadd.f32 %v131_v8, %v112_v7 }
  0xa6   :  { %v151_v10 = vpop.f32.mrf.mxu2 }
  0xa7   :  { %v152_v11 = vadd.f32 %v151_v10, %v132_v9  ;;  %v171_v12 = vpop.f32.mrf.mxu3 }
  0xa9   :  { %v172_v13 = vadd.f32 %v171_v12, %v152_v11 }
  0xab   :  { %175 = vst.msk [vmem:[#allocation2] sm:$0x3] %vm174_vm0, %v172_v13 }
  0xac   :  { %186 = dma.vmem_to_hbm [thread:$0]  %s182_s8, 32, %s184_s10, [#allocation3]  }
  0xad   :  { %218 = dma.done.wait [#allocation3], 32  }
  0xae   :  { %219 = vsyncadd [#allocation3], 4294967264 }
  0xaf   :  { %191 = vsyncpa [#allocation3], 1 }

</bundles_post_ra>
